<compile_context>
chip_gen: v7x
topology: tpu7x:2x2x1
jax: 0.10.0
libtpu: 0.0.40
codegen_flags: <defaults>
</compile_context>

<pallas_src>
import jax
import jax.numpy as jnp
import numpy as np
from jax.experimental import pallas as pl
from jax.experimental.pallas import tpu as pltpu


def _round_up(a, m):
    return ((a + m - 1) // m) * m


def _cdiv(a, b):
    return (a + b - 1) // b


# ---------------------------------------------------------------------------
# Fused kernel body: one block of whole sequences, one matmul per TCN level.
# ---------------------------------------------------------------------------
def _make_fused_kernel(n_layers):
    def kernel(*refs):
        x_ref = refs[0]
        layer_refs = refs[1:1 + 2 * n_layers]
        wd_ref = refs[1 + 2 * n_layers]
        bd_ref = refs[2 + 2 * n_layers]
        o_ref = refs[3 + 2 * n_layers]

        x0 = x_ref[...].astype(jnp.float32)                  # (S_blk, T*Cin)
        h = x0
        for li in range(n_layers):
            wb = layer_refs[2 * li][...].astype(jnp.float32)  # (T*Cin_i, T*Cout_i)
            b = layer_refs[2 * li + 1][...]                   # (1, T*Cout_i)
            h = jnp.dot(h, wb, preferred_element_type=jnp.float32) + b
            h = jnp.maximum(h, 0.0)
            # TODO(synk): Dropout(p=0.2) is identity at inference; training-mode
            # RNG dropout is not implemented here.

        # Residual path: relu(network(y) + downsample(y))
        ds = jnp.dot(x0, wd_ref[...].astype(jnp.float32),
                     preferred_element_type=jnp.float32) + bd_ref[...]
        o_ref[...] = jnp.maximum(h + ds, 0.0).astype(o_ref.dtype)

    return kernel


# ---------------------------------------------------------------------------
# Wrapper-side (tiny) weight transforms: fold the dilated causal conv into a
# block-banded matrix and the 1x1 downsample into a block-diagonal matrix.
# ---------------------------------------------------------------------------
def _banded_conv_weight(w, T, dilation):
    """w: (K, Cin, Cout) taps -> (T*Cin, T*Cout) block-banded weight.

    out[t] = sum_k  x[t - (K-1-k)*dilation] @ w[k]   (x == 0 outside [0, T))
    """
    K, cin, cout = w.shape
    wb = jnp.zeros((T * cin, T * cout), jnp.float32)
    for t in range(T):
        for k in range(K):
            src = t - (K - 1 - k) * dilation
            if src < 0:
                continue  # this tap reads the causal left zero-padding
            wb = wb.at[src * cin:(src + 1) * cin,
                       t * cout:(t + 1) * cout].set(w[k].astype(jnp.float32))
    return wb


def _block_diag_weight(wd, T):
    """wd: (Cin, Cout) 1x1 conv -> (T*Cin, T*Cout) block-diagonal weight."""
    cin, cout = wd.shape
    wb = jnp.zeros((T * cin, T * cout), jnp.float32)
    for t in range(T):
        wb = wb.at[t * cin:(t + 1) * cin,
                   t * cout:(t + 1) * cout].set(wd.astype(jnp.float32))
    return wb


# ---------------------------------------------------------------------------
# Block-size selection from a VMEM budget (safe on v5e / v6e / v7x).
# ---------------------------------------------------------------------------
_VMEM_LIMIT_BYTES = 48 * 1024 * 1024    # > 16/32 MiB scoped defaults, < v7x 64 MiB
_BLOCK_VMEM_BUDGET = 20 * 1024 * 1024   # target for blocks + live intermediates
_MAX_BLOCK_ROWS = 32768                 # top of the useful (rows) block range


def _per_seq_vmem_bytes(T, cin, channels):
    lane = lambda c: _round_up(T * c, 128)         # minor dim pads to 128 lanes
    n = 3 * lane(cin)                              # x block (double-buffered) + x0
    n += sum(2 * lane(c) for c in channels)        # per-level activation + result
    n += 3 * lane(channels[-1])                    # ds + output block (double-buffered)
    return 4 * n


def _weights_vmem_bytes(T, cin, channels):
    n, c_prev = 0, cin
    for c in channels:
        n += (T * c_prev) * (T * c) + T * c
        c_prev = c
    n += (T * cin) * (T * channels[-1]) + T * channels[-1]
    return 4 * n * 2                               # pessimistic: double-buffered


def _choose_seq_block(n_seq, T, cin, channels):
    budget = max(4 << 20,
                 _BLOCK_VMEM_BUDGET - _weights_vmem_bytes(T, cin, channels))
    per_seq = max(1, _per_seq_vmem_bytes(T, cin, channels))
    cap = budget // per_seq
    cap = min(cap, max(8, _MAX_BLOCK_ROWS // max(T, 1)))
    cap = max(8, (cap // 8) * 8)
    if n_seq <= cap:
        return _round_up(n_seq, 8)
    blk = cap
    # Keep >= 4 grid steps so each v7x TensorCore gets >= 2 pipelined steps.
    while blk > 8 and _cdiv(n_seq, blk) < 4:
        blk = max(8, ((blk // 2) // 8) * 8)
    return blk


# ---------------------------------------------------------------------------
# Public forward
# ---------------------------------------------------------------------------
def temporal_conv_net_forward(x, params):
    """x: (B, N, T, C_in) -> (B, N, T, num_channels[-1]). STGODE TCN forward."""
    B, N, T, Cin = x.shape

    if params["downsample"] is None:
        # Faithful to the PyTorch operator precedence: without a downsample the
        # conv stack's output is discarded and the result is relu(input).
        return jnp.maximum(x.astype(jnp.float32), 0.0)

    layer_ws = params["layers"]
    channels = [w.shape[2] for (w, _b) in layer_ws]
    CoutL = channels[-1]
    K = layer_ws[0][0].shape[0]
    n_layers = len(layer_ws)

    # One row per (b, n) sequence; minor dim = T*C.  Row-major, layout-
    # preserving reshape -> no HBM transpose on either boundary.
    S = B * N
    x2 = x.reshape(S, T * Cin).astype(jnp.float32)

    s_blk = _choose_seq_block(S, T, Cin, channels)
    grid_n = _cdiv(S, s_blk)
    S_pad = grid_n * s_blk
    if S_pad != S:
        x2 = jnp.pad(x2, ((0, S_pad - S), (0, 0)))   # < one block of pad rows

    inputs = [x2]
    in_specs = [pl.BlockSpec((s_blk, T * Cin), lambda i: (i, 0))]

    c_prev = Cin
    for li, (w, b) in enumerate(layer_ws):
        k_w, cin_w, cout = w.shape
        assert k_w == K and cin_w == c_prev
        wb = _banded_conv_weight(w, T, 2 ** li)          # (T*c_prev, T*cout)
        bflat = jnp.tile(b.astype(jnp.float32), T).reshape(1, T * cout)
        inputs += [wb, bflat]
        in_specs += [pl.BlockSpec((T * c_prev, T * cout), lambda i: (0, 0)),
                     pl.BlockSpec((1, T * cout), lambda i: (0, 0))]
        c_prev = cout

    wd, bd = params["downsample"]
    wdb = _block_diag_weight(wd, T)                       # (T*Cin, T*CoutL)
    bdflat = jnp.tile(bd.astype(jnp.float32), T).reshape(1, T * CoutL)
    inputs += [wdb, bdflat]
    in_specs += [pl.BlockSpec((T * Cin, T * CoutL), lambda i: (0, 0)),
                 pl.BlockSpec((1, T * CoutL), lambda i: (0, 0))]

    out2 = pl.pallas_call(
        _make_fused_kernel(n_layers),
        out_shape=jax.ShapeDtypeStruct((S_pad, T * CoutL), jnp.float32),
        grid=(grid_n,),
        in_specs=in_specs,
        out_specs=pl.BlockSpec((s_blk, T * CoutL), lambda i: (i, 0)),
        compiler_params=pltpu.CompilerParams(
            dimension_semantics=("parallel",),
            vmem_limit_bytes=_VMEM_LIMIT_BYTES),
    )(*inputs)

    if S_pad != S:
        out2 = out2[:S]
    return out2.reshape(B, N, T, CoutL)


# ---------------------------------------------------------------------------
# Deterministic parameter init (mirrors module __init__ shapes / init)
# ---------------------------------------------------------------------------
def init_params(key, num_inputs, num_channels, kernel_size):
    layers = []
    cin = num_inputs
    for cout in num_channels:
        key, kw, kb = jax.random.split(key, 3)
        # PyTorch weight (Cout, Cin, 1, K) stored here as (K, Cin, Cout);
        # same parameter count, normal(0, 0.01) init as in the module.
        w = 0.01 * jax.random.normal(kw, (kernel_size, cin, cout), jnp.float32)
        bound = 1.0 / np.sqrt(cin * kernel_size)
        b = jax.random.uniform(kb, (cout,), jnp.float32, -bound, bound)
        layers.append((w, b))
        cin = cout
    downsample = None
    if num_inputs != num_channels[-1]:
        key, kw, kb = jax.random.split(key, 3)
        wd = 0.01 * jax.random.normal(kw, (num_inputs, num_channels[-1]),
                                      jnp.float32)
        bound = 1.0 / np.sqrt(num_inputs)
        bd = jax.random.uniform(kb, (num_channels[-1],), jnp.float32,
                                -bound, bound)
        downsample = (wd, bd)
    return {"layers": layers, "downsample": downsample}


# ---------------------------------------------------------------------------
# Pure-JAX reference (float32, HIGHEST precision) for the correctness check
# ---------------------------------------------------------------------------
def reference_forward(x, params):
    B, N, T, Cin = x.shape
    hp = jax.lax.Precision.HIGHEST
    y = x.reshape(B * N, T, Cin).astype(jnp.float32)
    h = y
    for i, (w, b) in enumerate(params["layers"]):
        K = w.shape[0]
        d = 2 ** i
        acc = jnp.zeros((h.shape[0], T, w.shape[2]), jnp.float32)
        for k in range(K):
            s = (K - 1 - k) * d
            if s >= T:
                continue
            xs = h if s == 0 else jnp.pad(h, ((0, 0), (s, 0), (0, 0)))[:, :T, :]
            acc = acc + jnp.einsum("mtc,co->mto", xs, w[k], precision=hp)
        h = jnp.maximum(acc + b[None, None, :], 0.0)
    if params["downsample"] is not None:
        wd, bd = params["downsample"]
        ds = jnp.einsum("mtc,co->mto", y, wd, precision=hp) + bd[None, None, :]
        out = jnp.maximum(h + ds, 0.0)
    else:
        out = jnp.maximum(y, 0.0)
    return out.reshape(B, N, T, out.shape[-1])


if __name__ == "__main__":
    key = jax.random.PRNGKey(0)
    B, N, T = 2, 16, 8            # batch, nodes, time
    num_inputs = 4
    num_channels = [16, 32]       # two TCN levels (dilations 1, 2)
    kernel_size = 2

    kx, kp = jax.random.split(key)
    x = jax.random.normal(kx, (B, N, T, num_inputs), jnp.float32)
    params = init_params(kp, num_inputs, num_channels, kernel_size)

    fwd = jax.jit(temporal_conv_net_forward)
    out = jax.block_until_ready(fwd(x, params))

    ref = reference_forward(x, params)
    assert out.shape == (B, N, T, num_channels[-1]), out.shape
    # 1e-3 tolerance covers the (unlikely) case where the MXU path demotes f32
    # matmuls to a reduced-precision pass; with a true f32 path the error is ~1e-6.
    np.testing.assert_allclose(np.asarray(out), np.asarray(ref),
                               rtol=1e-3, atol=1e-3)
    print("KERNEL_OK")
</pallas_src>

<mosaic_0001>
module attributes {stable_mosaic.version = 11 : i64} {
  func.func @kernel(%arg0: i32, %arg1: memref<32x32xf32, #tpu.memory_space<vmem>>, %arg2: memref<32x128xf32, #tpu.memory_space<vmem>>, %arg3: memref<1x128xf32, #tpu.memory_space<vmem>>, %arg4: memref<128x256xf32, #tpu.memory_space<vmem>>, %arg5: memref<1x256xf32, #tpu.memory_space<vmem>>, %arg6: memref<32x256xf32, #tpu.memory_space<vmem>>, %arg7: memref<1x256xf32, #tpu.memory_space<vmem>>, %arg8: memref<32x256xf32, #tpu.memory_space<vmem>>) attributes {dimension_semantics = [#tpu.dimension_semantics<parallel>], iteration_bounds = array<i64: 1>, scalar_prefetch = 0 : i64, scratch_operands = 0 : i64, tpu.core_type = #tpu.core_type<tc>, window_params = [{transform_indices = @transform_0, window_bounds = array<i64: 32, 32>}, {pipeline_mode = #tpu.pipeline_mode<synchronous>, transform_indices = @transform_1, window_bounds = array<i64: 32, 128>}, {pipeline_mode = #tpu.pipeline_mode<synchronous>, transform_indices = @transform_2, window_bounds = array<i64: 1, 128>}, {pipeline_mode = #tpu.pipeline_mode<synchronous>, transform_indices = @transform_3, window_bounds = array<i64: 128, 256>}, {pipeline_mode = #tpu.pipeline_mode<synchronous>, transform_indices = @transform_4, window_bounds = array<i64: 1, 256>}, {pipeline_mode = #tpu.pipeline_mode<synchronous>, transform_indices = @transform_5, window_bounds = array<i64: 32, 256>}, {pipeline_mode = #tpu.pipeline_mode<synchronous>, transform_indices = @transform_6, window_bounds = array<i64: 1, 256>}, {transform_indices = @transform_7, window_bounds = array<i64: 32, 256>}]} {
    %c0 = arith.constant 0 : index
    %c0_0 = arith.constant 0 : index
    %0 = vector.load %arg1[%c0, %c0_0] : memref<32x32xf32, #tpu.memory_space<vmem>>, vector<32x32xf32>
    %c0_1 = arith.constant 0 : index
    %c0_2 = arith.constant 0 : index
    %1 = vector.load %arg2[%c0_1, %c0_2] : memref<32x128xf32, #tpu.memory_space<vmem>>, vector<32x128xf32>
    %c0_3 = arith.constant 0 : index
    %c0_4 = arith.constant 0 : index
    %2 = vector.load %arg3[%c0_3, %c0_4] : memref<1x128xf32, #tpu.memory_space<vmem>>, vector<1x128xf32>
    %cst = arith.constant dense<0.000000e+00> : vector<32x128xf32>
    %3 = tpu.matmul %0, %1, %cst {dimension_numbers = #tpu.dot_dimension_numbers<[1], [0], [0], [1], [0, 0, 1, 1], [], []>} : vector<32x32xf32>, vector<32x128xf32>, vector<32x128xf32> -> vector<32x128xf32>
    %4 = vector.broadcast %2 : vector<1x128xf32> to vector<32x128xf32>
    %5 = arith.addf %3, %4 : vector<32x128xf32>
    %cst_5 = arith.constant 0.000000e+00 : f32
    %6 = vector.broadcast %cst_5 : f32 to vector<32x128xf32>
    %7 = arith.maximumf %5, %6 : vector<32x128xf32>
    %c0_6 = arith.constant 0 : index
    %c0_7 = arith.constant 0 : index
    %8 = vector.load %arg4[%c0_6, %c0_7] : memref<128x256xf32, #tpu.memory_space<vmem>>, vector<128x256xf32>
    %c0_8 = arith.constant 0 : index
    %c0_9 = arith.constant 0 : index
    %9 = vector.load %arg5[%c0_8, %c0_9] : memref<1x256xf32, #tpu.memory_space<vmem>>, vector<1x256xf32>
    %cst_10 = arith.constant dense<0.000000e+00> : vector<32x256xf32>
    %10 = tpu.matmul %7, %8, %cst_10 {dimension_numbers = #tpu.dot_dimension_numbers<[1], [0], [0], [1], [0, 0, 1, 1], [], []>} : vector<32x128xf32>, vector<128x256xf32>, vector<32x256xf32> -> vector<32x256xf32>
    %11 = vector.broadcast %9 : vector<1x256xf32> to vector<32x256xf32>
    %12 = arith.addf %10, %11 : vector<32x256xf32>
    %cst_11 = arith.constant 0.000000e+00 : f32
    %13 = vector.broadcast %cst_11 : f32 to vector<32x256xf32>
    %14 = arith.maximumf %12, %13 : vector<32x256xf32>
    %c0_12 = arith.constant 0 : index
    %c0_13 = arith.constant 0 : index
    %15 = vector.load %arg6[%c0_12, %c0_13] : memref<32x256xf32, #tpu.memory_space<vmem>>, vector<32x256xf32>
    %cst_14 = arith.constant dense<0.000000e+00> : vector<32x256xf32>
    %16 = tpu.matmul %0, %15, %cst_14 {dimension_numbers = #tpu.dot_dimension_numbers<[1], [0], [0], [1], [0, 0, 1, 1], [], []>} : vector<32x32xf32>, vector<32x256xf32>, vector<32x256xf32> -> vector<32x256xf32>
    %c0_15 = arith.constant 0 : index
    %c0_16 = arith.constant 0 : index
    %17 = vector.load %arg7[%c0_15, %c0_16] : memref<1x256xf32, #tpu.memory_space<vmem>>, vector<1x256xf32>
    %18 = vector.broadcast %17 : vector<1x256xf32> to vector<32x256xf32>
    %19 = arith.addf %16, %18 : vector<32x256xf32>
    %20 = arith.addf %14, %19 : vector<32x256xf32>
    %cst_17 = arith.constant 0.000000e+00 : f32
    %21 = vector.broadcast %cst_17 : f32 to vector<32x256xf32>
    %22 = arith.maximumf %20, %21 : vector<32x256xf32>
    %c0_18 = arith.constant 0 : index
    %c0_19 = arith.constant 0 : index
    %23 = vector.load %arg8[%c0_18, %c0_19] : memref<32x256xf32, #tpu.memory_space<vmem>>, vector<32x256xf32>
    tpu.vector_store %arg8[%c0_18, %c0_19], %22 {strides = array<i32>} : memref<32x256xf32, #tpu.memory_space<vmem>>, vector<32x256xf32>,
    return
  }
  func.func @transform_0(%arg0: i32) -> (i32, i32) {
    %c0_i32 = arith.constant 0 : i32
    %c0_i32_0 = arith.constant 0 : i32
    return %arg0, %c0_i32 : i32, i32
  }
  func.func @transform_1(%arg0: i32) -> (i32, i32) {
    %c0_i32 = arith.constant 0 : i32
    %c0_i32_0 = arith.constant 0 : i32
    %c0_i32_1 = arith.constant 0 : i32
    return %c0_i32, %c0_i32_0 : i32, i32
  }
  func.func @transform_2(%arg0: i32) -> (i32, i32) {
    %c0_i32 = arith.constant 0 : i32
    %c0_i32_0 = arith.constant 0 : i32
    %c0_i32_1 = arith.constant 0 : i32
    return %c0_i32, %c0_i32_0 : i32, i32
  }
  func.func @transform_3(%arg0: i32) -> (i32, i32) {
    %c0_i32 = arith.constant 0 : i32
    %c0_i32_0 = arith.constant 0 : i32
    %c0_i32_1 = arith.constant 0 : i32
    return %c0_i32, %c0_i32_0 : i32, i32
  }
  func.func @transform_4(%arg0: i32) -> (i32, i32) {
    %c0_i32 = arith.constant 0 : i32
    %c0_i32_0 = arith.constant 0 : i32
    %c0_i32_1 = arith.constant 0 : i32
    return %c0_i32, %c0_i32_0 : i32, i32
  }
  func.func @transform_5(%arg0: i32) -> (i32, i32) {
    %c0_i32 = arith.constant 0 : i32
    %c0_i32_0 = arith.constant 0 : i32
    %c0_i32_1 = arith.constant 0 : i32
    return %c0_i32, %c0_i32_0 : i32, i32
  }
  func.func @transform_6(%arg0: i32) -> (i32, i32) {
    %c0_i32 = arith.constant 0 : i32
    %c0_i32_0 = arith.constant 0 : i32
    %c0_i32_1 = arith.constant 0 : i32
    return %c0_i32, %c0_i32_0 : i32, i32
  }
  func.func @transform_7(%arg0: i32) -> (i32, i32) {
    %c0_i32 = arith.constant 0 : i32
    %c0_i32_0 = arith.constant 0 : i32
    return %arg0, %c0_i32 : i32, i32
  }
}

</mosaic_0001>

<bundles_post_ra>
// kernel: tile.23
= control target key start
LH: loop header
LB: loop body
LE: loop exit
PB: predicated region body
PF: predicated region fallthrough
CT: control target
= control target key end

     0   :  { %s22_s0 = inlined_call_operand.vmem [shape: f32[32], index: 0, kind: input, shape index: {}]   ;;  %s23_s1 = inlined_call_operand.vmem [shape: f32[8,32], index: 1, kind: output, shape index: {}]  }
   0x1   :  { %v4_v0 = vld [vmem:[%s22_s0] ss:$0 sm:$0xff] }
   0x2   :  { %5 = vst [vmem:[%s23_s1] sm:$0xff] %v4_v0 }

// kernel: tile.24
= control target key start
LH: loop header
LB: loop body
LE: loop exit
PB: predicated region body
PF: predicated region fallthrough
CT: control target
= control target key end

     0   :  { %s7_s6 = smov 3  ;;  %s14_s9 = smov 3  ;;  %vm4_vm0 = vcmask 261120   ;;  %vm11_vm1 = vcmask 1048320   ;;  %vm18_vm2 = vcmask 785920   ;;  %vm25_vm3 = vcmask 523520   ;;  %s76_s0 = inlined_call_operand.vmem [shape: f32[8,32], index: 0, kind: input, shape index: {}]   ;;  %s77_s1 = inlined_call_operand.vmem [shape: f32[1,256], index: 1, kind: output, shape index: {}]  }
   0x1   :  { %v38_v0 = vld [vmem:[%s76_s0 + $0x3] ss:$4 sm:%s7_s6]   ;;  %s45_s10 = smov 96   ;;  %s21_s11 = smov 3  ;;  %v39_v1 = vld [vmem:[%s76_s0 + $0x2] ss:$4 sm:%s14_s9]  }
   0x2   :  { %9 = vrot.lane.b32.xlu0 %v38_v0, %s45_s10  ;;  %v40_v2 = vld [vmem:[%s76_s0 + $0x1] ss:$4 sm:%s21_s11]   ;;  %s2_s16 = smov 3  ;;  %s46_s17 = smov 32  }
   0x3   :  { %23 = vrot.lane.b32.xlu1 %v40_v2, %s46_s17  ;;  %v3_v3 = vld [vmem:[%s76_s0] ss:$4 sm:%s2_s16]   ;;  %s47_s0 = smov 64  }
   0x4   :  { %5 = vst.msk [vmem:[#allocation0] ss:$8 sm:$0x3] %vm4_vm0, %v3_v3  }
   0x6   :  { %16 = vrot.lane.b32.xlu0 %v39_v1, %s47_s0 }
  0x74   :  { %v10_v4 = vpop.permute.xlu0 %9  }
  0x75   :  { %12 = vst.msk [vmem:[#allocation0] ss:$8 sm:$0x3] %vm11_vm1, %v10_v4   ;;  %v24_v5 = vpop.permute.xlu1 %23  }
  0x78   :  { %v17_v6 = vpop.permute.xlu0 %16  }
  0x79   :  { %19 = vst.msk [vmem:[#allocation0] ss:$8 sm:$0x3] %vm18_vm2, %v17_v6  }
  0x7a   :  { %26 = vst.msk [vmem:[#allocation0] ss:$8 sm:$0x3] %vm25_vm3, %v24_v5  }
  0x81   :  { %v30_v7 = vld [vmem:[#allocation0] sm:$0x1]  ;;  %v34_v8 = vld [vmem:[#allocation0 + $0x8] sm:$0x1] }
  0x82   :  { %32 = vst [vmem:[%s77_s1] sm:$0x1] %v30_v7  ;;  %41 = vst [vmem:[%s77_s1 + $0x1] sm:$0x1] %v34_v8 }

// kernel: tile.18
= control target key start
LH: loop header
LB: loop body
LE: loop exit
PB: predicated region body
PF: predicated region fallthrough
CT: control target
= control target key end

     0   :  { %s22_s0 = inlined_call_operand.vmem [shape: f32[16], index: 0, kind: input, shape index: {}]   ;;  %s23_s1 = inlined_call_operand.vmem [shape: f32[8,16], index: 1, kind: output, shape index: {}]  }
   0x1   :  { %v4_v0 = vld [vmem:[%s22_s0] ss:$0 sm:$0xff] }
   0x2   :  { %5 = vst [vmem:[%s23_s1] sm:$0xff] %v4_v0 }

// kernel: tile.19
= control target key start
LH: loop header
LB: loop body
LE: loop exit
PB: predicated region body
PF: predicated region fallthrough
CT: control target
= control target key end

     0   :  { %s67_s10 = smov 112   ;;  %s68_s11 = smov 80   ;;  %vm3_vm0 = vcmask 130048   ;;  %vm9_vm1 = vcmask 1048448   ;;  %vm15_vm2 = vcmask 917248   ;;  %vm21_vm3 = vcmask 786048   ;;  %s111_s0 = inlined_call_operand.vmem [shape: f32[8,16], index: 0, kind: input, shape index: {}]   ;;  %s112_s1 = inlined_call_operand.vmem [shape: f32[1,128], index: 1, kind: output, shape index: {}]  }
   0x1   :  { %v53_v0 = vld [vmem:[%s111_s0 + $0x7] sm:$0x1]   ;;  %v55_v1 = vld [vmem:[%s111_s0 + $0x5] sm:$0x1]   ;;  %v54_v2 = vld [vmem:[%s111_s0 + $0x6] sm:$0x1]  }
   0x2   :  { %7 = vrot.lane.b32.xlu0 %v53_v0, %s67_s10  ;;  %19 = vrot.lane.b32.xlu1 %v55_v1, %s68_s11  ;;  %v56_v3 = vld [vmem:[%s111_s0 + $0x4] sm:$0x1]   ;;  %v2_v4 = vld [vmem:[%s111_s0] sm:$0x1]   ;;  %s69_s18 = smov 96   ;;  %s70_s19 = smov 64  }
   0x3   :  { %4 = vst.msk [vmem:[#allocation0] sm:$0x1] %vm3_vm0, %v2_v4   ;;  %v57_v5 = vld [vmem:[%s111_s0 + $0x3] sm:$0x1]   ;;  %v58_v6 = vld [vmem:[%s111_s0 + $0x2] sm:$0x1]  }
   0x4   :  { %s71_s24 = smov 48   ;;  %s72_s25 = smov 32   ;;  %v59_v7 = vld [vmem:[%s111_s0 + $0x1] sm:$0x1]   ;;  %vm27_vm4 = vcmask 654848   ;;  %vm33_vm5 = vcmask 523648  }
   0x5   :  { %s73_s0 = smov 16   ;;  %vm39_vm6 = vcmask 392448   ;;  %vm45_vm7 = vcmask 261248  }
   0x6   :  { %13 = vrot.lane.b32.xlu0 %v54_v2, %s69_s18  ;;  %25 = vrot.lane.b32.xlu1 %v56_v3, %s70_s19 }
   0xa   :  { %31 = vrot.lane.b32.xlu0 %v57_v5, %s71_s24  ;;  %37 = vrot.lane.b32.xlu1 %v58_v6, %s72_s25 }
   0xe   :  { %43 = vrot.lane.b32.xlu0 %v59_v7, %s73_s0 }
  0x74   :  { %v8_v8 = vpop.permute.xlu0 %7   ;;  %v20_v9 = vpop.permute.xlu1 %19  }
  0x75   :  { %10 = vst.msk [vmem:[#allocation0] sm:$0x1] %vm9_vm1, %v8_v8  }
  0x78   :  { %v14_v10 = vpop.permute.xlu0 %13   ;;  %v26_v11 = vpop.permute.xlu1 %25  }
  0x79   :  { %16 = vst.msk [vmem:[#allocation0] sm:$0x1] %vm15_vm2, %v14_v10  }
  0x7a   :  { %22 = vst.msk [vmem:[#allocation0] sm:$0x1] %vm21_vm3, %v20_v9  }
  0x7b   :  { %28 = vst.msk [vmem:[#allocation0] sm:$0x1] %vm27_vm4, %v26_v11  }
  0x7c   :  { %v32_v12 = vpop.permute.xlu0 %31   ;;  %v38_v13 = vpop.permute.xlu1 %37  }
  0x7d   :  { %34 = vst.msk [vmem:[#allocation0] sm:$0x1] %vm33_vm5, %v32_v12  }
  0x7e   :  { %40 = vst.msk [vmem:[#allocation0] sm:$0x1] %vm39_vm6, %v38_v13  }
  0x80   :  { %v44_v14 = vpop.permute.xlu0 %43  }
  0x81   :  { %46 = vst.msk [vmem:[#allocation0] sm:$0x1] %vm45_vm7, %v44_v14  }
  0x88   :  { %v50_v15 = vld [vmem:[#allocation0] sm:$0x1] }
  0x89   :  { %52 = vst [vmem:[%s112_s1] sm:$0x1] %v50_v15 }

// kernel: temporal_conv_net_forward.1
= control target key start
LH: loop header
LB: loop body
LE: loop exit
PB: predicated region body
PF: predicated region fallthrough
CT: control target
= control target key end

     0   :  { %vm41_vm0 = vcmask 261120   ;;  %s743_s1 = inlined_call_operand.vmem [shape: f32[32,128], index: 1, kind: input, shape index: {}]   ;;  %s744_s0 = inlined_call_operand.vmem [shape: f32[32,32], index: 0, kind: input, shape index: {}]   ;;  %s745_s3 = inlined_call_operand.vmem [shape: f32[128,256], index: 3, kind: input, shape index: {}]   ;;  %s746_s5 = inlined_call_operand.vmem [shape: f32[32,256], index: 5, kind: input, shape index: {}]   ;;  %s747_s2 = inlined_call_operand.vmem [shape: f32[1,128], index: 2, kind: input, shape index: {}]   ;;  %s748_s4 = inlined_call_operand.vmem [shape: f32[1,256], index: 4, kind: input, shape index: {}]   ;;  %s749_s6 = inlined_call_operand.vmem [shape: f32[1,256], index: 6, kind: input, shape index: {}]   ;;  %s750_s7 = inlined_call_operand.vmem [shape: f32[32,256], index: 7, kind: output, shape index: {}]  }
   0x1   :  { %v30_v0 = vld [vmem:[%s743_s1] sm:$0xff]  ;;  %v31_v1 = vld [vmem:[%s743_s1 + $0x8] sm:$0xff]  ;;  %v32_v2 = vld [vmem:[%s743_s1 + $0x10] sm:$0xff] }
   0x2   :  { %v452_v3 = vpack.c.bf16 %v31_v1, %v30_v0  ;;  %v33_v4 = vld [vmem:[%s743_s1 + $0x18] sm:$0xff]  ;;  %v557_v5 = vld [vmem:[%s744_s0] sm:$0xff]  ;;  %v144_v7 = vld [vmem:[%s745_s3 + $0x8] sm:$0xff] }
   0x3   :  { %v456_v6 = vpack.c.bf16 %v33_v4, %v32_v2  ;;  %446 = vmatprep.mubr.msk.f32.mxu0 %vm41_vm0, %v557_v5  ;;  %v146_v8 = vld [vmem:[%s745_s3 + $0x18] sm:$0xff]  ;;  %v143_v9 = vld [vmem:[%s745_s3] sm:$0xff]  ;;  %v145_v10 = vld [vmem:[%s745_s3 + $0x10] sm:$0xff] }
   0x4   :  { %453 = vmatprep.subr.bf16.mxu0 %v452_v3  ;;  %v460_v11 = vpack.c.bf16 %v146_v8, %v144_v7  ;;  %v462_v12 = vpack.c.bf16 %v145_v10, %v143_v9  ;;  %v148_v13 = vld [vmem:[%s745_s3 + $0x28] sm:$0xff]  ;;  %v150_v14 = vld [vmem:[%s745_s3 + $0x38] sm:$0xff]  ;;  %v147_v15 = vld [vmem:[%s745_s3 + $0x20] sm:$0xff]  ;;  %v501_v7 = vmov 0.0  }
   0x5   :  { %455 = vmatpush3.bf16.msra.mxu0 %v452_v3  ;;  %v464_v16 = vpack.c.bf16 %v150_v14, %v148_v13  ;;  %v149_v17 = vld [vmem:[%s745_s3 + $0x30] sm:$0xff]  ;;  %v152_v18 = vld [vmem:[%s745_s3 + $0x48] sm:$0xff]  ;;  %v154_v19 = vld [vmem:[%s745_s3 + $0x58] sm:$0xff]  ;;  %251 = vmatprep.mubr.f32.mxu1 %v501_v7 }
   0x6   :  { %457 = vmatprep.subr.bf16.mxu0 %v456_v6  ;;  %461 = vmatprep.subr.bf16.mxu1 %v460_v11  ;;  %v466_v20 = vpack.c.bf16 %v149_v17, %v147_v15  ;;  %v594_v21 = vld [vmem:[%s744_s0 + $0x8] sm:$0xff]  ;;  %v468_v22 = vpack.c.bf16 %v154_v19, %v152_v18  ;;  %v151_v23 = vld [vmem:[%s745_s3 + $0x40] sm:$0xff]  ;;  %v153_v24 = vld [vmem:[%s745_s3 + $0x50] sm:$0xff] }
   0x7   :  { %463 = vmatpush1.bf16.msra.mxu1 %v462_v12  ;;  %v605_v25 = vld [vmem:[%s744_s0 + $0x10] sm:$0xff]  ;;  %v156_v26 = vld [vmem:[%s745_s3 + $0x68] sm:$0xff]  ;;  %v158_v27 = vld [vmem:[%s745_s3 + $0x78] sm:$0xff]  ;;  %v470_v29 = vpack.c.bf16 %v153_v24, %v151_v23 }
   0x8   :  { %465 = vmatprep.subr.bf16.mxu1 %v464_v16  ;;  %v618_v28 = vld [vmem:[%s744_s0 + $0x18] sm:$0xff]  ;;  %v155_v30 = vld [vmem:[%s745_s3 + $0x60] sm:$0xff]  ;;  %v472_v31 = vpack.c.bf16 %v158_v27, %v156_v26  ;;  %v157_v32 = vld [vmem:[%s745_s3 + $0x70] sm:$0xff] }
   0x9   :  { %459 = vmatpush3.bf16.msra.mxu0 %v456_v6  ;;  %v285_v33 = vld [vmem:[%s746_s5 + $0x8] sm:$0xff]  ;;  %v287_v34 = vld [vmem:[%s746_s5 + $0x18] sm:$0xff]  ;;  %v474_v38 = vpack.c.bf16 %v157_v32, %v155_v30  ;;  %v159_v40 = vld [vmem:[%s745_s3 + $0x80] sm:$0xff] }
   0xa   :  { %v160_v35 = vld [vmem:[%s745_s3 + $0x88] sm:$0xff]  ;;  %v162_v36 = vld [vmem:[%s745_s3 + $0x98] sm:$0xff]  ;;  %v492_v37 = vpack.c.bf16 %v287_v34, %v285_v33  ;;  %v161_v41 = vld [vmem:[%s745_s3 + $0x90] sm:$0xff] }
   0xb   :  { %467 = vmatpush1.bf16.msra.mxu1 %v466_v20  ;;  %v476_v39 = vpack.c.bf16 %v162_v36, %v160_v35  ;;  %v164_v42 = vld [vmem:[%s745_s3 + $0xa8] sm:$0xff]  ;;  %v166_v43 = vld [vmem:[%s745_s3 + $0xb8] sm:$0xff]  ;;  %v478_v44 = vpack.c.bf16 %v161_v41, %v159_v40  ;;  %v163_v46 = vld [vmem:[%s745_s3 + $0xa0] sm:$0xff] }
   0xc   :  { %447 = vmatmul.mubr.msk.f32.vlgmr.msra.gmra.mrb[0].mxu0 %vm41_vm0, %v594_v21  ;;  %469 = vmatprep.subr.bf16.mxu1 %v468_v22  ;;  %v480_v45 = vpack.c.bf16 %v166_v43, %v164_v42  ;;  %v165_v47 = vld [vmem:[%s745_s3 + $0xb0] sm:$0xff]  ;;  %v168_v48 = vld [vmem:[%s745_s3 + $0xc8] sm:$0xff]  ;;  %v170_v49 = vld [vmem:[%s745_s3 + $0xd8] sm:$0xff] }
   0xd   :  { %449 = vmatprep.mubr.msk.f32.mxu0 %vm41_vm0, %v605_v25  ;;  %493 = vmatprep.subr.bf16.mxu0 %v492_v37  ;;  %v482_v50 = vpack.c.bf16 %v165_v47, %v163_v46  ;;  %v484_v51 = vpack.c.bf16 %v170_v49, %v168_v48  ;;  %v167_v52 = vld [vmem:[%s745_s3 + $0xc0] sm:$0xff]  ;;  %v169_v53 = vld [vmem:[%s745_s3 + $0xd0] sm:$0xff]  ;;  %v172_v58 = vld [vmem:[%s745_s3 + $0xe8] sm:$0xff] }
   0xe   :  { %v486_v54 = vpack.c.bf16 %v169_v53, %v167_v52  ;;  %v284_v55 = vld [vmem:[%s746_s5] sm:$0xff]  ;;  %v286_v56 = vld [vmem:[%s746_s5 + $0x10] sm:$0xff]  ;;  %v174_v59 = vld [vmem:[%s745_s3 + $0xf8] sm:$0xff] }
   0xf   :  { %471 = vmatpush1.bf16.msra.mxu1 %v470_v29  ;;  %v494_v57 = vpack.c.bf16 %v286_v56, %v284_v55  ;;  %v488_v60 = vpack.c.bf16 %v174_v59, %v172_v58  ;;  %v171_v61 = vld [vmem:[%s745_s3 + $0xe0] sm:$0xff]  ;;  %v173_v62 = vld [vmem:[%s745_s3 + $0xf0] sm:$0xff]  ;;  %v289_v0 = vld [vmem:[%s746_s5 + $0x28] sm:$0xff] }
  0x10   :  { %450 = vmatmul.mubr.msk.f32.gmra.mrb[2].mxu0 %vm41_vm0, %v618_v28  ;;  %473 = vmatprep.subr.bf16.mxu1 %v472_v31  ;;  %v490_v63 = vpack.c.bf16 %v173_v62, %v171_v61  ;;  %v291_v1 = vld [vmem:[%s746_s5 + $0x38] sm:$0xff]  ;;  %v288_v2 = vld [vmem:[%s746_s5 + $0x20] sm:$0xff]  ;;  %v290_v4 = vld [vmem:[%s746_s5 + $0x30] sm:$0xff] }
  0x11   :  { %495 = vmatpush1.bf16.msra.mxu0 %v494_v57  ;;  %v496_v3 = vpack.c.bf16 %v291_v1, %v289_v0  ;;  %v498_v6 = vpack.c.bf16 %v290_v4, %v288_v2  ;;  %368 = vmatprep.mubr.f32.mxu0 %v501_v7  ;;  %v421_v8 = vld [vmem:[%s747_s2] ss:$0 sm:$0xff] }
  0x12   :  { %v175_v31 = vld [vmem:[%s748_s4] sm:$0x3] }
  0x13   :  { %475 = vmatpush1.bf16.msra.mxu1 %v474_v38  ;;  %497 = vmatprep.subr.bf16.mxu0 %v496_v3  ;;  %v292_v33 = vld [vmem:[%s749_s6] sm:$0x3] }
  0x14   :  { %477 = vmatprep.subr.bf16.mxu1 %v476_v39 }
  0x15   :  { %499 = vmatpush1.bf16.msra.mxu0 %v498_v6 }
  0x17   :  { %479 = vmatpush1.bf16.msra.mxu1 %v478_v44 }
  0x18   :  { %481 = vmatprep.subr.bf16.mxu1 %v480_v45  ;;  %426 = vmatmul.mubr.msk.f32.vlgmr.msra.gmra.mrb[4].mxu0 %vm41_vm0, %v557_v5 }
  0x19   :  { %374 = vmatprep.mubr.f32.mxu0 %v501_v7 }
  0x1b   :  { %483 = vmatpush1.bf16.msra.mxu1 %v482_v50 }
  0x1c   :  { %485 = vmatprep.subr.bf16.mxu1 %v484_v51  ;;  %427 = vmatmul.mubr.msk.f32.gmra.mrb[6].mxu0 %vm41_vm0, %v594_v21 }
  0x1d   :  { %380 = vmatprep.mubr.f32.mxu0 %v501_v7 }
  0x1f   :  { %487 = vmatpush1.bf16.msra.mxu1 %v486_v54 }
  0x20   :  { %489 = vmatprep.subr.bf16.mxu1 %v488_v60  ;;  %428 = vmatmul.mubr.msk.f32.gmra.mrb[8].mxu0 %vm41_vm0, %v605_v25 }
  0x21   :  { %386 = vmatprep.mubr.f32.mxu0 %v501_v7 }
  0x23   :  { %491 = vmatpush1.bf16.msra.mxu1 %v490_v63 }
  0x24   :  { %429 = vmatmul.mubr.msk.f32.gmra.mrb[10].mxu0 %vm41_vm0, %v618_v28  ;;  %v177_v28 = vlaneseq }
  0x26   :  { %v178_v29 = vshrl.u32 %v177_v28, 7 }
  0x28   :  { %v179_v30 = vsub.s32 0, %v178_v29  ;;  %v183_v32 = vsub.s32 1, %v178_v29 }
  0x2a   :  { %v180_v34 = vrot.slane %v175_v31, %v179_v30  ;;  %v297_v35 = vrot.slane %v292_v33, %v179_v30  ;;  %v184_v36 = vrot.slane %v175_v31, %v183_v32  ;;  %v301_v37 = vrot.slane %v292_v33, %v183_v32 }
  0xdf   :  { %v448_v9 = vpop.f32.mrb[0].mxu0 }
  0xe0   :  { %v120_v10 = vpop.f32.mrb[1].mxu0  ;;  %v126_v5 = vadd.f32 %v448_v9, %v421_v8 }
  0xe1   :  { %v121_v11 = vadd.f32 %v421_v8, %v120_v10 }
  0xe2   :  { %v140_v16 = vmax.f32 %v126_v5, 0.0 }
  0xe3   :  { %v139_v12 = vmax.f32 %v121_v11, 0.0  ;;  %v451_v13 = vpop.f32.mrb[2].mxu0 }
  0xe4   :  { %v130_v14 = vpop.f32.mrb[3].mxu0  ;;  %v136_v18 = vadd.f32 %v451_v13, %v421_v8 }
  0xe5   :  { %252 = vmatmul.mubr.f32.vlgmr.msra.gmra.mrb[0].mxu1 %v139_v12  ;;  %v131_v15 = vadd.f32 %v421_v8, %v130_v14 }
  0xe6   :  { %257 = vmatprep.mubr.f32.mxu1 %v501_v7  ;;  %v142_v19 = vmax.f32 %v136_v18, 0.0 }
  0xe7   :  { %v141_v17 = vmax.f32 %v131_v15, 0.0 }
  0xe9   :  { %258 = vmatmul.mubr.f32.gmra.mrb[2].mxu1 %v140_v16 }
  0xea   :  { %263 = vmatprep.mubr.f32.mxu1 %v501_v7 }
  0xeb   :  { %v370_v20 = vpop.f32.mrb[4].mxu0 }
  0xec   :  { %v372_v21 = vpop.f32.mrb[5].mxu0  ;;  %v371_v41 = vadd.f32 %v370_v20, %v297_v35 }
  0xed   :  { %264 = vmatmul.mubr.f32.gmra.mrb[4].mxu1 %v141_v17  ;;  %v373_v43 = vadd.f32 %v372_v21, %v301_v37 }
  0xee   :  { %269 = vmatprep.mubr.f32.mxu1 %v501_v7 }
  0xef   :  { %v376_v22 = vpop.f32.mrb[6].mxu0 }
  0xf0   :  { %v378_v23 = vpop.f32.mrb[7].mxu0  ;;  %v377_v50 = vadd.f32 %v376_v22, %v297_v35 }
  0xf1   :  { %270 = vmatmul.mubr.f32.gmra.mrb[6].mxu1 %v142_v19  ;;  %v379_v53 = vadd.f32 %v378_v23, %v301_v37 }
  0xf3   :  { %v382_v24 = vpop.f32.mrb[8].mxu0 }
  0xf4   :  { %v384_v25 = vpop.f32.mrb[9].mxu0  ;;  %v383_v62 = vadd.f32 %v382_v24, %v297_v35 }
  0xf5   :  { %v385_v1 = vadd.f32 %v384_v25, %v301_v37 }
  0xf7   :  { %v388_v26 = vpop.f32.mrb[10].mxu0 }
  0xf8   :  { %v390_v27 = vpop.f32.mrb[11].mxu0  ;;  %v389_v11 = vadd.f32 %v388_v26, %v297_v35 }
  0xf9   :  { %v391_v13 = vadd.f32 %v390_v27, %v301_v37 }
 0x1b8   :  { %v253_v38 = vpop.f32.mrb[0].mxu1 }
 0x1b9   :  { %v254_v39 = vadd.f32 %v253_v38, %v180_v34  ;;  %v255_v40 = vpop.f32.mrb[1].mxu1 }
 0x1ba   :  { %v256_v42 = vadd.f32 %v255_v40, %v184_v36 }
 0x1bb   :  { %v276_v44 = vmax.f32 %v254_v39, 0.0 }
 0x1bc   :  { %v277_v45 = vmax.f32 %v256_v42, 0.0  ;;  %v259_v46 = vpop.f32.mrb[2].mxu1 }
 0x1bd   :  { %v393_v47 = vadd.f32 %v371_v41, %v276_v44  ;;  %v260_v48 = vadd.f32 %v259_v46, %v180_v34  ;;  %v261_v49 = vpop.f32.mrb[3].mxu1 }
 0x1be   :  { %v394_v51 = vadd.f32 %v373_v43, %v277_v45  ;;  %v262_v52 = vadd.f32 %v261_v49, %v184_v36 }
 0x1bf   :  { %v401_v54 = vmax.f32 %v393_v47, 0.0  ;;  %v278_v55 = vmax.f32 %v260_v48, 0.0 }
 0x1c0   :  { %v402_v56 = vmax.f32 %v394_v51, 0.0  ;;  %v279_v57 = vmax.f32 %v262_v52, 0.0  ;;  %v265_v58 = vpop.f32.mrb[4].mxu1 }
 0x1c1   :  { %409 = vst [vmem:[%s750_s7] sm:$0xff] %v401_v54  ;;  %v395_v59 = vadd.f32 %v377_v50, %v278_v55  ;;  %v266_v60 = vadd.f32 %v265_v58, %v180_v34  ;;  %v267_v61 = vpop.f32.mrb[5].mxu1 }
 0x1c2   :  { %410 = vst [vmem:[%s750_s7 + $0x8] sm:$0xff] %v402_v56  ;;  %v396_v63 = vadd.f32 %v379_v53, %v279_v57  ;;  %v268_v0 = vadd.f32 %v267_v61, %v184_v36 }
 0x1c3   :  { %v403_v2 = vmax.f32 %v395_v59, 0.0  ;;  %v280_v3 = vmax.f32 %v266_v60, 0.0 }
 0x1c4   :  { %v404_v4 = vmax.f32 %v396_v63, 0.0  ;;  %v281_v6 = vmax.f32 %v268_v0, 0.0  ;;  %v271_v7 = vpop.f32.mrb[6].mxu1 }
 0x1c5   :  { %411 = vst [vmem:[%s750_s7 + $0x10] sm:$0xff] %v403_v2  ;;  %v397_v8 = vadd.f32 %v383_v62, %v280_v3  ;;  %v272_v9 = vadd.f32 %v271_v7, %v180_v34  ;;  %v273_v10 = vpop.f32.mrb[7].mxu1 }
 0x1c6   :  { %412 = vst [vmem:[%s750_s7 + $0x18] sm:$0xff] %v404_v4  ;;  %v398_v5 = vadd.f32 %v385_v1, %v281_v6  ;;  %v274_v12 = vadd.f32 %v273_v10, %v184_v36 }
 0x1c7   :  { %v405_v14 = vmax.f32 %v397_v8, 0.0  ;;  %v282_v15 = vmax.f32 %v272_v9, 0.0 }
 0x1c8   :  { %v406_v16 = vmax.f32 %v398_v5, 0.0  ;;  %v283_v17 = vmax.f32 %v274_v12, 0.0 }
 0x1c9   :  { %413 = vst [vmem:[%s750_s7 + $0x20] sm:$0xff] %v405_v14  ;;  %v399_v18 = vadd.f32 %v389_v11, %v282_v15 }
 0x1ca   :  { %414 = vst [vmem:[%s750_s7 + $0x28] sm:$0xff] %v406_v16  ;;  %v400_v19 = vadd.f32 %v391_v13, %v283_v17 }
 0x1cb   :  { %v407_v20 = vmax.f32 %v399_v18, 0.0 }
 0x1cc   :  { %v408_v21 = vmax.f32 %v400_v19, 0.0 }
 0x1cd   :  { %415 = vst [vmem:[%s750_s7 + $0x30] sm:$0xff] %v407_v20 }
 0x1ce   :  { %416 = vst [vmem:[%s750_s7 + $0x38] sm:$0xff] %v408_v21 }

</bundles_post_ra>
